<compile_context>
chip_gen: v5e
topology: v5e:2x2
jax: 0.10.0
libtpu: 0.0.40
codegen_flags: <defaults>
</compile_context>

<pallas_src>
import functools

import jax
import jax.numpy as jnp
from jax.experimental import pallas as pl
from jax.experimental.pallas import tpu as pltpu


def _round_up(x, m):
    return ((x + m - 1) // m) * m


def encoder_kernel(x_ref, w1_ref, b1_ref, w2_ref, b2_ref, wh_ref, bh_ref,
                   out_ref, *, z_dim, compute_dtype):
    """One batch tile: 3 MXU matmuls + relu + fused (z_loc | exp(z_scale)) head."""
    cd = compute_dtype
    x = x_ref[...].astype(cd)                                  # (tb, Md)

    h2 = jnp.dot(x, w1_ref[...], preferred_element_type=jnp.float32)
    h2 = jnp.maximum(h2 + b1_ref[...], 0.0)                    # relu(fc1), f32

    h = jnp.dot(h2.astype(cd), w2_ref[...], preferred_element_type=jnp.float32)
    h = jnp.maximum(h + b2_ref[...], 0.0)                      # relu(fc2), f32

    # Fused head: columns [0, z_dim) -> z_loc, [z_dim, 2*z_dim) -> z_scale.
    zc = jnp.dot(h.astype(cd), wh_ref[...], preferred_element_type=jnp.float32)
    zc = zc + bh_ref[...]

    cols = jax.lax.broadcasted_iota(jnp.int32, zc.shape, dimension=1)
    zc = jnp.where(cols >= z_dim, jnp.exp(zc), zc)             # exp on scale half (EUP)
    out_ref[...] = zc.astype(out_ref.dtype)


def encoder_forward(x, params, Md, *, batch_tile=None,
                    compute_dtype=jnp.bfloat16,
                    vmem_budget_bytes=4 << 20):
    """x: any shape whose elements flatten to (-1, Md), like torch reshape."""
    w1, b1, w2, b2, w21, b21, w22, b22 = params
    out_dtype = x.dtype

    x2d = x.reshape(-1, Md)
    B = x2d.shape[0]

    hidden_dim2 = w1.shape[1]
    hidden_dim = w2.shape[1]
    z_dim = w21.shape[1]

    # ---- pad feature dims to lane-friendly multiples of 128 -----------------
    H2 = _round_up(hidden_dim2, 128)
    H = _round_up(hidden_dim, 128)
    P = _round_up(2 * z_dim, 128)           # fused (z_loc | z_scale), lane dense

    def pad2(a, rows, cols):
        return jnp.pad(a, ((0, rows - a.shape[0]), (0, cols - a.shape[1])))

    w1p = pad2(w1, Md, H2).astype(compute_dtype)
    b1p = pad2(b1, 1, H2).astype(jnp.float32)
    w2p = pad2(w2, H2, H).astype(compute_dtype)
    b2p = pad2(b2, 1, H).astype(jnp.float32)
    wh = jnp.concatenate([w21, w22], axis=1)       # (hidden_dim, 2*z_dim)
    bh = jnp.concatenate([b21, b22], axis=1)       # (1, 2*z_dim)
    whp = pad2(wh, H, P).astype(compute_dtype)
    bhp = pad2(bh, 1, P).astype(jnp.float32)

    xin = x2d.astype(compute_dtype)                # halves the dominant HBM stream

    # ---- pick a batch tile: multiple of 8 (ideally 128), VMEM-budgeted ------
    if batch_tile is None:
        in_bytes = jnp.dtype(compute_dtype).itemsize
        per_row = (2 * Md * in_bytes           # double-buffered x tile
                   + (H2 + H) * 4              # f32 activations
                   + 2 * P * 4)                # double-buffered output tile
        t = max(8, vmem_budget_bytes // max(per_row, 1))
        t = min(t, 1024, _round_up(B, 8))
        batch_tile = (t // 128) * 128 if t >= 128 else (t // 8) * 8
    batch_tile = max(8, _round_up(batch_tile, 8))

    B_pad = _round_up(B, batch_tile)
    if B_pad != B:
        xin = jnp.pad(xin, ((0, B_pad - B), (0, 0)))

    grid = (B_pad // batch_tile,)

    def full(arr):
        nd = arr.ndim
        return pl.BlockSpec(arr.shape, lambda i: (0,) * nd)

    flops = 2 * B_pad * (Md * H2 + H2 * H + H * P)
    bytes_accessed = (xin.size * xin.dtype.itemsize
                      + sum(a.size * a.dtype.itemsize
                            for a in (w1p, b1p, w2p, b2p, whp, bhp))
                      + B_pad * P * jnp.dtype(out_dtype).itemsize)
    cost = pl.CostEstimate(flops=flops,
                           transcendentals=B_pad * P,
                           bytes_accessed=bytes_accessed)

    kernel = functools.partial(encoder_kernel, z_dim=z_dim,
                               compute_dtype=compute_dtype)

    out = pl.pallas_call(
        kernel,
        out_shape=jax.ShapeDtypeStruct((B_pad, P), out_dtype),
        grid_spec=pl.GridSpec(
            grid=grid,
            in_specs=[
                pl.BlockSpec((batch_tile, Md), lambda i: (i, 0)),
                full(w1p), full(b1p),
                full(w2p), full(b2p),
                full(whp), full(bhp),
            ],
            out_specs=pl.BlockSpec((batch_tile, P), lambda i: (i, 0)),
        ),
        compiler_params=pltpu.CompilerParams(
            dimension_semantics=("parallel",),
            vmem_limit_bytes=32 * 1024 * 1024,
        ),
        cost_estimate=cost,
    )(xin, w1p, b1p, w2p, b2p, whp, bhp)

    z_loc = out[:B, :z_dim]
    z_scale = out[:B, z_dim:2 * z_dim]
    return z_loc, z_scale


def init_params(key, z_dim, hidden_dim, hidden_dim2, Md, dtype=jnp.float32):
    """Deterministic synthetic params. Weights stored as (in, out) — i.e. W.T."""
    ks = jax.random.split(key, 8)

    def lin(kw, kb, fan_in, fan_out):
        bound = 1.0 / jnp.sqrt(fan_in)
        w = jax.random.uniform(kw, (fan_in, fan_out), dtype, -bound, bound)
        b = jax.random.uniform(kb, (1, fan_out), dtype, -bound, bound)
        return w, b

    w1, b1 = lin(ks[0], ks[1], Md, hidden_dim2)
    w2, b2 = lin(ks[2], ks[3], hidden_dim2, hidden_dim)
    w21, b21 = lin(ks[4], ks[5], hidden_dim, z_dim)
    w22, b22 = lin(ks[6], ks[7], hidden_dim, z_dim)
    return (w1, b1, w2, b2, w21, b21, w22, b22)


def reference_forward(x, params, Md, compute_dtype=jnp.float32):
    """Pure-JAX reference mirroring the PyTorch forward (same operand casts)."""
    w1, b1, w2, b2, w21, b21, w22, b22 = params
    cd = compute_dtype
    x = x.reshape(-1, Md).astype(cd)
    h2 = jax.nn.relu(
        jnp.dot(x, w1.astype(cd), preferred_element_type=jnp.float32) + b1)
    h = jax.nn.relu(
        jnp.dot(h2.astype(cd), w2.astype(cd), preferred_element_type=jnp.float32) + b2)
    z_loc = jnp.dot(h.astype(cd), w21.astype(cd),
                    preferred_element_type=jnp.float32) + b21
    z_scale = jnp.exp(jnp.dot(h.astype(cd), w22.astype(cd),
                              preferred_element_type=jnp.float32) + b22)
    return z_loc, z_scale


if __name__ == "__main__":
    # Small shapes consistent with the module's forward.
    z_dim, hidden_dim, hidden_dim2, Md = 16, 32, 64, 32
    batch = 512                      # enough rows to exercise a 4-step grid

    key = jax.random.PRNGKey(0)
    k_x, k_p = jax.random.split(key)

    x = jax.random.normal(k_x, (batch, Md), dtype=jnp.float32)
    params = init_params(k_p, z_dim, hidden_dim, hidden_dim2, Md)

    # Default bf16-MXU path (f32 accumulation) — check vs. matching reference.
    z_loc, z_scale = encoder_forward(x, params, Md, batch_tile=128,
                                     compute_dtype=jnp.bfloat16)
    jax.block_until_ready((z_loc, z_scale))
    ref_loc, ref_scale = reference_forward(x, params, Md,
                                           compute_dtype=jnp.bfloat16)
    assert z_loc.shape == (batch, z_dim) and z_scale.shape == (batch, z_dim)
    assert jnp.allclose(z_loc, ref_loc, atol=1e-2, rtol=1e-2)
    assert jnp.allclose(z_scale, ref_scale, atol=1e-2, rtol=1e-2)

    # Full-f32 path — exact module semantics.
    z_loc32, z_scale32 = encoder_forward(x, params, Md, batch_tile=128,
                                         compute_dtype=jnp.float32)
    jax.block_until_ready((z_loc32, z_scale32))
    ref_loc32, ref_scale32 = reference_forward(x, params, Md)
    assert jnp.allclose(z_loc32, ref_loc32, atol=1e-3, rtol=1e-3)
    assert jnp.allclose(z_scale32, ref_scale32, atol=1e-3, rtol=1e-3)

    print("KERNEL_OK")
</pallas_src>

<mosaic_0001>
module attributes {stable_mosaic.version = 11 : i64} {
  func.func @encoder_kernel(%arg0: i32, %arg1: memref<128x32xbf16, #tpu.memory_space<vmem>>, %arg2: memref<32x128xbf16, #tpu.memory_space<vmem>>, %arg3: memref<1x128xf32, #tpu.memory_space<vmem>>, %arg4: memref<128x128xbf16, #tpu.memory_space<vmem>>, %arg5: memref<1x128xf32, #tpu.memory_space<vmem>>, %arg6: memref<128x128xbf16, #tpu.memory_space<vmem>>, %arg7: memref<1x128xf32, #tpu.memory_space<vmem>>, %arg8: memref<128x128xf32, #tpu.memory_space<vmem>>) attributes {dimension_semantics = [#tpu.dimension_semantics<parallel>], iteration_bounds = array<i64: 4>, scalar_prefetch = 0 : i64, scratch_operands = 0 : i64, tpu.core_type = #tpu.core_type<tc>, window_params = [{transform_indices = @transform_0, window_bounds = array<i64: 128, 32>}, {pipeline_mode = #tpu.pipeline_mode<synchronous>, transform_indices = @transform_1, window_bounds = array<i64: 32, 128>}, {pipeline_mode = #tpu.pipeline_mode<synchronous>, transform_indices = @transform_2, window_bounds = array<i64: 1, 128>}, {pipeline_mode = #tpu.pipeline_mode<synchronous>, transform_indices = @transform_3, window_bounds = array<i64: 128, 128>}, {pipeline_mode = #tpu.pipeline_mode<synchronous>, transform_indices = @transform_4, window_bounds = array<i64: 1, 128>}, {pipeline_mode = #tpu.pipeline_mode<synchronous>, transform_indices = @transform_5, window_bounds = array<i64: 128, 128>}, {pipeline_mode = #tpu.pipeline_mode<synchronous>, transform_indices = @transform_6, window_bounds = array<i64: 1, 128>}, {transform_indices = @transform_7, window_bounds = array<i64: 128, 128>}]} {
    %c0 = arith.constant 0 : index
    %c0_0 = arith.constant 0 : index
    %0 = vector.load %arg1[%c0, %c0_0] : memref<128x32xbf16, #tpu.memory_space<vmem>>, vector<128x32xbf16>
    %c0_1 = arith.constant 0 : index
    %c0_2 = arith.constant 0 : index
    %1 = vector.load %arg2[%c0_1, %c0_2] : memref<32x128xbf16, #tpu.memory_space<vmem>>, vector<32x128xbf16>
    %cst = arith.constant dense<0.000000e+00> : vector<128x128xf32>
    %2 = tpu.matmul %0, %1, %cst {dimension_numbers = #tpu.dot_dimension_numbers<[1], [0], [0], [1], [0, 0, 1, 1], [], []>} : vector<128x32xbf16>, vector<32x128xbf16>, vector<128x128xf32> -> vector<128x128xf32>
    %c0_3 = arith.constant 0 : index
    %c0_4 = arith.constant 0 : index
    %3 = vector.load %arg3[%c0_3, %c0_4] : memref<1x128xf32, #tpu.memory_space<vmem>>, vector<1x128xf32>
    %4 = vector.broadcast %3 : vector<1x128xf32> to vector<128x128xf32>
    %5 = arith.addf %2, %4 : vector<128x128xf32>
    %cst_5 = arith.constant 0.000000e+00 : f32
    %6 = vector.broadcast %cst_5 : f32 to vector<128x128xf32>
    %7 = arith.maximumf %5, %6 : vector<128x128xf32>
    %8 = arith.truncf %7 : vector<128x128xf32> to vector<128x128xbf16>
    %c0_6 = arith.constant 0 : index
    %c0_7 = arith.constant 0 : index
    %9 = vector.load %arg4[%c0_6, %c0_7] : memref<128x128xbf16, #tpu.memory_space<vmem>>, vector<128x128xbf16>
    %cst_8 = arith.constant dense<0.000000e+00> : vector<128x128xf32>
    %10 = tpu.matmul %8, %9, %cst_8 {dimension_numbers = #tpu.dot_dimension_numbers<[1], [0], [0], [1], [0, 0, 1, 1], [], []>} : vector<128x128xbf16>, vector<128x128xbf16>, vector<128x128xf32> -> vector<128x128xf32>
    %c0_9 = arith.constant 0 : index
    %c0_10 = arith.constant 0 : index
    %11 = vector.load %arg5[%c0_9, %c0_10] : memref<1x128xf32, #tpu.memory_space<vmem>>, vector<1x128xf32>
    %12 = vector.broadcast %11 : vector<1x128xf32> to vector<128x128xf32>
    %13 = arith.addf %10, %12 : vector<128x128xf32>
    %cst_11 = arith.constant 0.000000e+00 : f32
    %14 = vector.broadcast %cst_11 : f32 to vector<128x128xf32>
    %15 = arith.maximumf %13, %14 : vector<128x128xf32>
    %16 = arith.truncf %15 : vector<128x128xf32> to vector<128x128xbf16>
    %c0_12 = arith.constant 0 : index
    %c0_13 = arith.constant 0 : index
    %17 = vector.load %arg6[%c0_12, %c0_13] : memref<128x128xbf16, #tpu.memory_space<vmem>>, vector<128x128xbf16>
    %cst_14 = arith.constant dense<0.000000e+00> : vector<128x128xf32>
    %18 = tpu.matmul %16, %17, %cst_14 {dimension_numbers = #tpu.dot_dimension_numbers<[1], [0], [0], [1], [0, 0, 1, 1], [], []>} : vector<128x128xbf16>, vector<128x128xbf16>, vector<128x128xf32> -> vector<128x128xf32>
    %c0_15 = arith.constant 0 : index
    %c0_16 = arith.constant 0 : index
    %19 = vector.load %arg7[%c0_15, %c0_16] : memref<1x128xf32, #tpu.memory_space<vmem>>, vector<1x128xf32>
    %20 = vector.broadcast %19 : vector<1x128xf32> to vector<128x128xf32>
    %21 = arith.addf %18, %20 : vector<128x128xf32>
    %22 = tpu.iota {dimensions = array<i32: 1>} : vector<128x128xi32>
    %c16_i32 = arith.constant 16 : i32
    %23 = vector.broadcast %c16_i32 : i32 to vector<128x128xi32>
    %24 = arith.cmpi sge, %22, %23 : vector<128x128xi32>
    %25 = math.exp %21 : vector<128x128xf32>
    %26 = arith.select %24, %25, %21 : vector<128x128xi1>, vector<128x128xf32>
    %c0_17 = arith.constant 0 : index
    %c0_18 = arith.constant 0 : index
    %27 = vector.load %arg8[%c0_17, %c0_18] : memref<128x128xf32, #tpu.memory_space<vmem>>, vector<128x128xf32>
    tpu.vector_store %arg8[%c0_17, %c0_18], %26 {strides = array<i32>} : memref<128x128xf32, #tpu.memory_space<vmem>>, vector<128x128xf32>,
    return
  }
  func.func @transform_0(%arg0: i32) -> (i32, i32) {
    %c0_i32 = arith.constant 0 : i32
    %c0_i32_0 = arith.constant 0 : i32
    return %arg0, %c0_i32 : i32, i32
  }
  func.func @transform_1(%arg0: i32) -> (i32, i32) {
    %c0_i32 = arith.constant 0 : i32
    %c0_i32_0 = arith.constant 0 : i32
    %c0_i32_1 = arith.constant 0 : i32
    return %c0_i32, %c0_i32_0 : i32, i32
  }
  func.func @transform_2(%arg0: i32) -> (i32, i32) {
    %c0_i32 = arith.constant 0 : i32
    %c0_i32_0 = arith.constant 0 : i32
    %c0_i32_1 = arith.constant 0 : i32
    return %c0_i32, %c0_i32_0 : i32, i32
  }
  func.func @transform_3(%arg0: i32) -> (i32, i32) {
    %c0_i32 = arith.constant 0 : i32
    %c0_i32_0 = arith.constant 0 : i32
    %c0_i32_1 = arith.constant 0 : i32
    return %c0_i32, %c0_i32_0 : i32, i32
  }
  func.func @transform_4(%arg0: i32) -> (i32, i32) {
    %c0_i32 = arith.constant 0 : i32
    %c0_i32_0 = arith.constant 0 : i32
    %c0_i32_1 = arith.constant 0 : i32
    return %c0_i32, %c0_i32_0 : i32, i32
  }
  func.func @transform_5(%arg0: i32) -> (i32, i32) {
    %c0_i32 = arith.constant 0 : i32
    %c0_i32_0 = arith.constant 0 : i32
    %c0_i32_1 = arith.constant 0 : i32
    return %c0_i32, %c0_i32_0 : i32, i32
  }
  func.func @transform_6(%arg0: i32) -> (i32, i32) {
    %c0_i32 = arith.constant 0 : i32
    %c0_i32_0 = arith.constant 0 : i32
    %c0_i32_1 = arith.constant 0 : i32
    return %c0_i32, %c0_i32_0 : i32, i32
  }
  func.func @transform_7(%arg0: i32) -> (i32, i32) {
    %c0_i32 = arith.constant 0 : i32
    %c0_i32_0 = arith.constant 0 : i32
    return %arg0, %c0_i32 : i32, i32
  }
}

</mosaic_0001>

<bundles_post_ra>
// kernel: tpu_custom_call.1
= control target key start
LH: loop header
LB: loop body
LE: loop exit
PB: predicated region body
PF: predicated region fallthrough
CT: control target
= control target key end

     0   :  { %12 = vsyncpa [#allocation3], 0  ;;  %s1466_s0 = inlined_call_operand.vmem [shape: bf16[512,32], index: 0, kind: input, shape index: {}]   ;;  %s1467_s1 = inlined_call_operand.vmem [shape: bf16[32,128], index: 1, kind: input, shape index: {}]   ;;  %s1468_s2 = inlined_call_operand.vmem [shape: f32[1,128], index: 2, kind: input, shape index: {}]   ;;  %s1469_s3 = inlined_call_operand.vmem [shape: bf16[128,128], index: 3, kind: input, shape index: {}]   ;;  %s1470_s4 = inlined_call_operand.vmem [shape: f32[1,128], index: 4, kind: input, shape index: {}]   ;;  %s1471_s5 = inlined_call_operand.vmem [shape: bf16[128,128], index: 5, kind: input, shape index: {}]   ;;  %s1472_s6 = inlined_call_operand.vmem [shape: f32[1,128], index: 6, kind: input, shape index: {}]   ;;  %s1473_s7 = inlined_call_operand.hbm [shape: f32[512,128], index: 7, kind: output, shape index: {}]  }
   0x1   :  { %14 = vsyncpa [#allocation3 + $0x1], 0  ;;  %s1207_s24 = smov 0   ;;  %s1209_s25 = smov 0  }
   0x2   :  { %s1211_s26 = smov 0   ;;  %s1213_s27 = smov 0  }
   0x3 LB: > { %s1228_s28 = sadd.s32 4294967295, %s1163_s27   ;;  %s858_s29 = sadd.s32 4294967294, %s1163_s27   ;;  %s1163_s27 = sphi %s1213_s27, %s1479_s27   ;;  %s1159_s26 = sphi %s1211_s26, %s1478_s26   ;;  %s1155_s25 = sphi %s1209_s25, %s1477_s25   ;;  %s1151_s24 = sphi %s1207_s24, %s1476_s24  }
   0x4   : > { %s1232_s30 = sadd.s32 1, %s1163_s27   ;;  %s179_s8 = sadd.s32 1, %s1159_s26 }
   0x5   : > { %s176_s9 = ssub.s32 %s1163_s27, %s1232_s30  ;;  %p189_p0 = scmp.ne.s32.totalorder %s1159_s26, %s1155_s25 }
   0x6   : > { %p177_p1 = scmp.eq.s32.totalorder %s176_s9, 0  ;;  %p190_p2 = scmp.eq.s32.totalorder %s1228_s28, 3 }
   0x7   : > { %p195_p3 = scmp.ne.s32.totalorder %s1155_s25, %s1151_s24  ;;  %p196_p4 = scmp.eq.s32.totalorder %s858_s29, 3 }
   0x8   : > { %s1243_s10 = scalar_select %p177_p1, %s1159_s26, %s179_s8  }
   0x9   : > { %p1245_p5 = por %p190_p2, %p189_p0  ;;  %p1249_p6 = por %p196_p4, %p195_p3 }
   0xa   : > { %p861_p7 = scmp.ge.s32.totalorder %s1163_s27, 1  ;;  %p241_p8 = scmp.lt.s32.totalorder %s1163_s27, 5 }
   0xc   : > { %p242_p9 = pnand %p861_p7, %p241_p8 }
   0xd   : > { %s863_s15 = sshll.u32 (!%p242_p9), %s1228_s28, 4  ;;  %s1008_s22 = sshll.u32 (!%p242_p9), %s1228_s28, 7 }
   0xe   : > { %245 = sbr.rel (%p242_p9) target bundleno = 581 (0x245), region = 48  ;;  %p274_p10 = scmp.lt.s32.totalorder (!%p242_p9), %s863_s15, 63 }
   0xf   : > { %s792_s8 = scalar_lea.hbm (!%p242_p9), %s1473_s7, %s1008_s22  ;;  %s1121_s17 = scalar_lea.hbm (!%p242_p9), %s1473_s7, 512 }
  0x13   : > { %v991_v0 = vld [vmem:[%s1467_s1 + $0x8] sm:$0xff]  ;;  %v990_v1 = vld [vmem:[%s1467_s1] sm:$0xff]  ;;  %s1481_s15 = smov (!%p274_p10, %s863_s15), 63  ;;  %vm357_vm0 = vcmask 261120   ;;  %v999_v7 = vld [vmem:[%s1469_s3 + $0x38] sm:$0xff] }
  0x14   : > { %388 = vmatpush.bf16.msra.mxu0 %v991_v0  ;;  %s864_s18 = sshll.u32 %s1481_s15, 2  ;;  %523 = vmatpush.bf16.msra.mxu1 %v999_v7  ;;  %v998_v9 = vld [vmem:[%s1469_s3 + $0x30] sm:$0xff]  ;;  %v997_v10 = vld [vmem:[%s1469_s3 + $0x28] sm:$0xff]  ;;  %v996_v11 = vld [vmem:[%s1469_s3 + $0x20] sm:$0xff] }
  0x15   : > { %s1265_s21 = scalar_lea.vmem %s1466_s0, %s864_s18  ;;  %1009 = vmatpush.bf16.msra.mxu3 %v999_v7  ;;  %v995_v12 = vld [vmem:[%s1469_s3 + $0x18] sm:$0xff]  ;;  %v994_v14 = vld [vmem:[%s1469_s3 + $0x10] sm:$0xff]  ;;  %v993_v15 = vld [vmem:[%s1469_s3 + $0x8] sm:$0xff]  ;;  %s270_s18 = sand.u32 1, %s1155_s25  }
  0x16   : > { %v982_v2 = vld [vmem:[%s1265_s21] sm:$0xff]  ;;  %v983_v3 = vld [vmem:[%s1265_s21 + $0x8] sm:$0xff]  ;;  %v984_v4 = vld [vmem:[%s1265_s21 + $0x10] sm:$0xff]  ;;  %s862_s19 = sshll.u32 %s270_s18, 7  ;;  %s781_s28 = scalar_lea.sflag [#allocation3], %s270_s18 }
  0x17   : > { %v985_v5 = vld [vmem:[%s1265_s21 + $0x18] sm:$0xff]  ;;  %v986_v6 = vld [vmem:[%s1265_s21 + $0x20] sm:$0xff]  ;;  %v987_v8 = vld [vmem:[%s1265_s21 + $0x28] sm:$0xff]  ;;  %s1370_s20 = scalar_lea.vmem [#allocation2], %s862_s19 }
  0x18   : > { %389 = vmatpush.bf16.msra.mxu0 %v990_v1  ;;  %524 = vmatpush.bf16.msra.mxu1 %v998_v9  ;;  %v988_v13 = vld [vmem:[%s1265_s21 + $0x30] sm:$0xff]  ;;  %v992_v16 = vld [vmem:[%s1469_s3] sm:$0xff]  ;;  %v989_v17 = vld [vmem:[%s1265_s21 + $0x38] sm:$0xff]  ;;  %s793_s9 = sshll.u32 %s1370_s20, 4  ;;  %s795_s21 = sshll.u32 %s792_s8, 4  ;;  %s794_s9 = int_to_ptr.vmem [resolvable:$true] %s793_s9  ;;  %s796_s21 = int_to_ptr.hbm [resolvable:$true] %s795_s21 }
  0x19   : > { %1010 = vmatpush.bf16.msra.mxu3 %v998_v9  ;;  %v1310_v19 = vld [vmem:[%s1468_s2] ss:$0 sm:$0xff]  ;;  %v1007_v58 = vld [vmem:[%s1471_s5 + $0x38] sm:$0xff]  ;;  %v1006_v62 = vld [vmem:[%s1471_s5 + $0x30] sm:$0xff]  ;;  %s1115_s13 = sshra.s32 %s796_s21, 4  ;;  %s1116_s13 = int_to_ptr.hbm [resolvable:$true] %s1115_s13 }
  0x1a   : > { %664 = vmatpush.bf16.msra.mxu2 %v1007_v58  ;;  %v1005_v0 = vld [vmem:[%s1471_s5 + $0x28] sm:$0xff]  ;;  %v1004_v1 = vld [vmem:[%s1471_s5 + $0x20] sm:$0xff]  ;;  %v1002_v9 = vld [vmem:[%s1471_s5 + $0x10] sm:$0xff]  ;;  %s1117_s14 = scalar_lea.hbm %s1116_s13, 128  ;;  %p1122_p0 = scmp.lt.s32.totalorder %s1116_s13, %s1473_s7 }
  0x1b   : > { %905 = vmatmul.msk.bf16.vlgmr.msra.gmra.mxu0 %vm357_vm0, %v982_v2  ;;  %p1118_p11 = scmp.ne.s32.totalorder %s1116_s13, %s1117_s14  ;;  %p1123_p1 = scmp.lt.s32.totalorder %s1121_s17, %s1117_s14 }
  0x1c   : > { %525 = vmatpush.bf16.msra.mxu1 %v997_v10 }
  0x1d   : > { %1011 = vmatpush.bf16.msra.mxu3 %v997_v10  ;;  %p1119_p12 = pnand %p1118_p11, %p1245_p5  ;;  %p1124_p2 = por %p1123_p1, %p1122_p0 }
  0x1e   : > { %665 = vmatpush.bf16.msra.mxu2 %v1006_v62 }
  0x1f   : > { %p1120_p13 = pneg %p1119_p12 }
  0x20   : > { %526 = vmatpush.bf16.msra.mxu1 %v996_v11 }
  0x21   : > { %1012 = vmatpush.bf16.msra.mxu3 %v996_v11  ;;  %v1001_v11 = vld [vmem:[%s1471_s5 + $0x8] sm:$0xff]  ;;  %p1125_p3 = pnand %p1124_p2, %p1120_p13 }
  0x22   : > { %666 = vmatpush.bf16.msra.mxu2 %v1005_v0 }
  0x24   : > { %527 = vmatpush.bf16.msra.mxu1 %v995_v12 }
  0x25   : > { %1013 = vmatpush.bf16.msra.mxu3 %v995_v12  ;;  %v1000_v12 = vld [vmem:[%s1471_s5] sm:$0xff] }
  0x26   : > { %667 = vmatpush.bf16.msra.mxu2 %v1004_v1 }
  0x28   : > { %528 = vmatpush.bf16.msra.mxu1 %v994_v14 }
  0x29   : > { %1014 = vmatpush.bf16.msra.mxu3 %v994_v14 }
  0x2b   : > { %906 = vmatmul.msk.bf16.gmra.mxu0 %vm357_vm0, %v983_v3 }
  0x2c   : > { %529 = vmatpush.bf16.msra.mxu1 %v993_v15 }
  0x2d   : > { %1015 = vmatpush.bf16.msra.mxu3 %v993_v15 }
  0x30   : > { %530 = vmatpush.bf16.msra.mxu1 %v992_v16 }
  0x31   : > { %1016 = vmatpush.bf16.msra.mxu3 %v992_v16 }
  0x35   : > { %1017 = vmatpush.bf16.msrb.mxu3 %v1007_v58 }
  0x39   : > { %1018 = vmatpush.bf16.msrb.mxu3 %v1006_v62 }
  0x3b   : > { %907 = vmatmul.msk.bf16.gmra.mxu0 %vm357_vm0, %v984_v4 }
  0x3d   : > { %1019 = vmatpush.bf16.msrb.mxu3 %v1005_v0 }
  0x41   : > { %1020 = vmatpush.bf16.msrb.mxu3 %v1004_v1 }
  0x4b   : > { %908 = vmatmul.msk.bf16.gmra.mxu0 %vm357_vm0, %v985_v5  ;;  %v1003_v5 = vld [vmem:[%s1471_s5 + $0x18] sm:$0xff] }
  0x4c   : > { %668 = vmatpush.bf16.msra.mxu2 %v1003_v5  ;;  %1021 = vmatpush.bf16.msrb.mxu3 %v1003_v5 }
  0x50   : > { %669 = vmatpush.bf16.msra.mxu2 %v1002_v9  ;;  %1022 = vmatpush.bf16.msrb.mxu3 %v1002_v9 }
  0x54   : > { %670 = vmatpush.bf16.msra.mxu2 %v1001_v11  ;;  %1023 = vmatpush.bf16.msrb.mxu3 %v1001_v11 }
  0x58   : > { %671 = vmatpush.bf16.msra.mxu2 %v1000_v12  ;;  %1024 = vmatpush.bf16.msrb.mxu3 %v1000_v12  ;;  %v1358_v12 = vld [vmem:[%s1472_s6] ss:$0 sm:$0xff] }
  0x5b   : > { %909 = vmatmul.msk.bf16.gmra.mxu0 %vm357_vm0, %v986_v6 }
  0x6b   : > { %910 = vmatmul.msk.bf16.gmra.mxu0 %vm357_vm0, %v987_v8 }
  0x7b   : > { %911 = vmatmul.msk.bf16.gmra.mxu0 %vm357_vm0, %v988_v13 }
  0x8b   : > { %912 = vmatmul.msk.bf16.gmra.mxu0 %vm357_vm0, %v989_v17 }
  0x98   : > { %v391_v18 = vpop.f32.mrf.mxu0 }
  0x99   : > { %v392_v20 = vadd.f32 %v1310_v19, %v391_v18 }
  0x9b   : > { %v431_v23 = vmax.f32 %v392_v20, 0.0 }
  0xa0   : > { %v393_v21 = vpop.f32.mrf.mxu0 }
  0xa1   : > { %v394_v22 = vadd.f32 %v1310_v19, %v393_v21  ;;  %v1067_v21 = vld [vmem:[%s1470_s4] ss:$0 sm:$0xff] }
  0xa3   : > { %v432_v24 = vmax.f32 %v394_v22, 0.0 }
  0xa5   : > { %v447_v25 = vpack.c.bf16 %v432_v24, %v431_v23 }
  0xa7   : > { %531 = vmatmul.bf16.vlgmr.msra.gmra.mxu1 %v447_v25 }
  0xa8   : > { %v396_v26 = vpop.f32.mrf.mxu0 }
  0xa9   : > { %v397_v27 = vadd.f32 %v1310_v19, %v396_v26 }
  0xab   : > { %v433_v30 = vmax.f32 %v397_v27, 0.0 }
  0xb0   : > { %v398_v28 = vpop.f32.mrf.mxu0 }
  0xb1   : > { %v399_v29 = vadd.f32 %v1310_v19, %v398_v28 }
  0xb3   : > { %v434_v31 = vmax.f32 %v399_v29, 0.0 }
  0xb5   : > { %v448_v32 = vpack.c.bf16 %v434_v31, %v433_v30 }
  0xb7   : > { %536 = vmatmul.bf16.gmra.mxu1 %v448_v32 }
  0xb8   : > { %v401_v33 = vpop.f32.mrf.mxu0 }
  0xb9   : > { %v402_v34 = vadd.f32 %v1310_v19, %v401_v33 }
  0xbb   : > { %v435_v37 = vmax.f32 %v402_v34, 0.0 }
  0xc0   : > { %v403_v35 = vpop.f32.mrf.mxu0 }
  0xc1   : > { %v404_v36 = vadd.f32 %v1310_v19, %v403_v35 }
  0xc3   : > { %v436_v38 = vmax.f32 %v404_v36, 0.0 }
  0xc5   : > { %v449_v39 = vpack.c.bf16 %v436_v38, %v435_v37 }
  0xc7   : > { %541 = vmatmul.bf16.gmra.mxu1 %v449_v39 }
  0xc8   : > { %v406_v40 = vpop.f32.mrf.mxu0 }
  0xc9   : > { %v407_v41 = vadd.f32 %v1310_v19, %v406_v40 }
  0xcb   : > { %v437_v44 = vmax.f32 %v407_v41, 0.0 }
  0xd0   : > { %v408_v42 = vpop.f32.mrf.mxu0 }
  0xd1   : > { %v409_v43 = vadd.f32 %v1310_v19, %v408_v42 }
  0xd3   : > { %v438_v45 = vmax.f32 %v409_v43, 0.0 }
  0xd5   : > { %v450_v46 = vpack.c.bf16 %v438_v45, %v437_v44 }
  0xd7   : > { %546 = vmatmul.bf16.gmra.mxu1 %v450_v46 }
  0xd8   : > { %v411_v47 = vpop.f32.mrf.mxu0 }
  0xd9   : > { %v412_v48 = vadd.f32 %v1310_v19, %v411_v47 }
  0xdb   : > { %v439_v51 = vmax.f32 %v412_v48, 0.0 }
  0xe0   : > { %v413_v49 = vpop.f32.mrf.mxu0 }
  0xe1   : > { %v414_v50 = vadd.f32 %v1310_v19, %v413_v49 }
  0xe3   : > { %v440_v52 = vmax.f32 %v414_v50, 0.0 }
  0xe5   : > { %v451_v53 = vpack.c.bf16 %v440_v52, %v439_v51 }
  0xe7   : > { %551 = vmatmul.bf16.gmra.mxu1 %v451_v53 }
  0xe8   : > { %v416_v54 = vpop.f32.mrf.mxu0 }
  0xe9   : > { %v417_v55 = vadd.f32 %v1310_v19, %v416_v54 }
  0xeb   : > { %v441_v59 = vmax.f32 %v417_v55, 0.0 }
  0xf0   : > { %v418_v56 = vpop.f32.mrf.mxu0 }
  0xf1   : > { %v419_v57 = vadd.f32 %v1310_v19, %v418_v56 }
  0xf3   : > { %v442_v60 = vmax.f32 %v419_v57, 0.0 }
  0xf5   : > { %v452_v61 = vpack.c.bf16 %v442_v60, %v441_v59 }
  0xf7   : > { %556 = vmatmul.bf16.gmra.mxu1 %v452_v61 }
  0xf8   : > { %v421_v63 = vpop.f32.mrf.mxu0 }
  0xf9   : > { %v422_v2 = vadd.f32 %v1310_v19, %v421_v63 }
  0xfb   : > { %v443_v6 = vmax.f32 %v422_v2, 0.0 }
 0x100   : > { %v423_v3 = vpop.f32.mrf.mxu0 }
 0x101   : > { %v424_v4 = vadd.f32 %v1310_v19, %v423_v3 }
 0x103   : > { %v444_v7 = vmax.f32 %v424_v4, 0.0 }
 0x105   : > { %v453_v8 = vpack.c.bf16 %v444_v7, %v443_v6 }
 0x107   : > { %561 = vmatmul.bf16.vlgmr.msra.gmra.mxu3 %v453_v8 }
 0x108   : > { %v426_v10 = vpop.f32.mrf.mxu0 }
 0x109   : > { %v427_v13 = vadd.f32 %v1310_v19, %v426_v10 }
 0x10b   : > { %v445_v16 = vmax.f32 %v427_v13, 0.0 }
 0x110   : > { %v428_v14 = vpop.f32.mrf.mxu0 }
 0x111   : > { %v429_v15 = vadd.f32 %v1310_v19, %v428_v14 }
 0x113   : > { %v446_v17 = vmax.f32 %v429_v15, 0.0  ;;  %v713_v15 = vlaneseq }
 0x115   : > { %v454_v18 = vpack.c.bf16 %v446_v17, %v445_v16  ;;  %v1362_v17 = vand.u32 127, %v713_v15 }
 0x117   : > { %566 = vmatmul.bf16.gmra.mxu3 %v454_v18  ;;  %vm715_vm1 = vcmp.ge.s32.totalorder %v1362_v17, 16 }
 0x124   : > { %v532_v20 = vpop.f32.mrf.mxu1 }
 0x125   : > { %v533_v22 = vadd.f32 %v1067_v21, %v532_v20 }
 0x127   : > { %v572_v25 = vmax.f32 %v533_v22, 0.0 }
 0x12c   : > { %v534_v23 = vpop.f32.mrf.mxu1 }
 0x12d   : > { %v535_v24 = vadd.f32 %v1067_v21, %v534_v23 }
 0x12f   : > { %v573_v26 = vmax.f32 %v535_v24, 0.0 }
 0x131   : > { %v588_v27 = vpack.c.bf16 %v573_v26, %v572_v25 }
 0x133   : > { %672 = vmatmul.bf16.vlgmr.msra.gmra.mxu2 %v588_v27 }
 0x134   : > { %v537_v28 = vpop.f32.mrf.mxu1 }
 0x135   : > { %v538_v29 = vadd.f32 %v1067_v21, %v537_v28 }
 0x137   : > { %v574_v31 = vmax.f32 %v538_v29, 0.0 }
 0x13c   : > { %v539_v30 = vpop.f32.mrf.mxu1 }
 0x13d   : > { %v540_v19 = vadd.f32 %v1067_v21, %v539_v30 }
 0x13f   : > { %v575_v32 = vmax.f32 %v540_v19, 0.0 }
 0x141   : > { %v589_v33 = vpack.c.bf16 %v575_v32, %v574_v31 }
 0x143   : > { %677 = vmatmul.bf16.gmra.mxu2 %v589_v33 }
 0x144   : > { %v542_v34 = vpop.f32.mrf.mxu1 }
 0x145   : > { %v543_v35 = vadd.f32 %v1067_v21, %v542_v34 }
 0x147   : > { %v576_v38 = vmax.f32 %v543_v35, 0.0 }
 0x14c   : > { %v544_v36 = vpop.f32.mrf.mxu1 }
 0x14d   : > { %v545_v37 = vadd.f32 %v1067_v21, %v544_v36 }
 0x14f   : > { %v577_v39 = vmax.f32 %v545_v37, 0.0 }
 0x151   : > { %v590_v40 = vpack.c.bf16 %v577_v39, %v576_v38 }
 0x153   : > { %682 = vmatmul.bf16.gmra.mxu2 %v590_v40 }
 0x154   : > { %v547_v41 = vpop.f32.mrf.mxu1 }
 0x155   : > { %v548_v42 = vadd.f32 %v1067_v21, %v547_v41 }
 0x157   : > { %v578_v45 = vmax.f32 %v548_v42, 0.0 }
 0x15c   : > { %v549_v43 = vpop.f32.mrf.mxu1 }
 0x15d   : > { %v550_v44 = vadd.f32 %v1067_v21, %v549_v43 }
 0x15f   : > { %v579_v46 = vmax.f32 %v550_v44, 0.0 }
 0x161   : > { %v591_v47 = vpack.c.bf16 %v579_v46, %v578_v45 }
 0x163   : > { %687 = vmatmul.bf16.gmra.mxu2 %v591_v47 }
 0x164   : > { %v552_v48 = vpop.f32.mrf.mxu1 }
 0x165   : > { %v553_v49 = vadd.f32 %v1067_v21, %v552_v48 }
 0x167   : > { %v580_v52 = vmax.f32 %v553_v49, 0.0 }
 0x16c   : > { %v554_v50 = vpop.f32.mrf.mxu1 }
 0x16d   : > { %v555_v51 = vadd.f32 %v1067_v21, %v554_v50 }
 0x16f   : > { %v581_v53 = vmax.f32 %v555_v51, 0.0 }
 0x171   : > { %v592_v54 = vpack.c.bf16 %v581_v53, %v580_v52 }
 0x173   : > { %692 = vmatmul.bf16.gmra.mxu2 %v592_v54 }
 0x174   : > { %v557_v55 = vpop.f32.mrf.mxu1 }
 0x175   : > { %v558_v56 = vadd.f32 %v1067_v21, %v557_v55 }
 0x177   : > { %v582_v59 = vmax.f32 %v558_v56, 0.0 }
 0x17c   : > { %v559_v57 = vpop.f32.mrf.mxu1 }
 0x17d   : > { %v560_v58 = vadd.f32 %v1067_v21, %v559_v57 }
 0x17f   : > { %v583_v60 = vmax.f32 %v560_v58, 0.0 }
 0x181   : > { %v593_v61 = vpack.c.bf16 %v583_v60, %v582_v59 }
 0x183   : > { %697 = vmatmul.bf16.gmra.mxu2 %v593_v61 }
 0x18a   : > { %v562_v62 = vpop.f32.mrf.mxu3 }
 0x18b   : > { %v563_v63 = vadd.f32 %v1067_v21, %v562_v62 }
 0x18d   : > { %v584_v2 = vmax.f32 %v563_v63, 0.0 }
 0x192   : > { %v564_v0 = vpop.f32.mrf.mxu3 }
 0x193   : > { %v565_v1 = vadd.f32 %v1067_v21, %v564_v0 }
 0x195   : > { %v585_v3 = vmax.f32 %v565_v1, 0.0 }
 0x197   : > { %v594_v4 = vpack.c.bf16 %v585_v3, %v584_v2 }
 0x199   : > { %702 = vmatmul.bf16.vlgmr.msrb.gmra.mxu3 %v594_v4 }
 0x19a   : > { %v567_v5 = vpop.f32.mrf.mxu3 }
 0x19b   : > { %v568_v6 = vadd.f32 %v1067_v21, %v567_v5 }
 0x19d   : > { %v586_v9 = vmax.f32 %v568_v6, 0.0 }
 0x1a2   : > { %v569_v7 = vpop.f32.mrf.mxu3 }
 0x1a3   : > { %v570_v8 = vadd.f32 %v1067_v21, %v569_v7 }
 0x1a5   : > { %v587_v10 = vmax.f32 %v570_v8, 0.0 }
 0x1a7   : > { %v595_v11 = vpack.c.bf16 %v587_v10, %v586_v9 }
 0x1a9   : > { %707 = vmatmul.bf16.gmra.mxu3 %v595_v11 }
 0x1b6   : > { %v673_v13 = vpop.f32.mrf.mxu2 }
 0x1b7   : > { %v674_v14 = vadd.f32 %v1358_v12, %v673_v13 }
 0x1b9   : > { %v716_v16 = vmul.f32 1.442695, %v674_v14 }
 0x1bb   : > { %1069 = vpow2.f32 %v716_v16 }
 0x1be   : > { %v675_v18 = vpop.f32.mrf.mxu2 }
 0x1bf   : > { %v676_v20 = vadd.f32 %v1358_v12, %v675_v18 }
 0x1c1   : > { %v1070_v21 = vpop.eup %1069  ;;  %v718_v22 = vmul.f32 1.442695, %v676_v20 }
 0x1c2   : > { %v748_v23 = vsel %vm715_vm1, %v1070_v21, %v674_v14 }
 0x1c3   : > { %764 = vst [vmem:[%s1370_s20] sm:$0xff] %v748_v23  ;;  %1071 = vpow2.f32 %v718_v22 }
 0x1c6   : > { %v678_v24 = vpop.f32.mrf.mxu2 }
 0x1c7   : > { %v679_v25 = vadd.f32 %v1358_v12, %v678_v24 }
 0x1c9   : > { %v1072_v26 = vpop.eup %1071  ;;  %v720_v27 = vmul.f32 1.442695, %v679_v25 }
 0x1ca   : > { %v749_v28 = vsel %vm715_vm1, %v1072_v26, %v676_v20 }
 0x1cb   : > { %765 = vst [vmem:[%s1370_s20 + $0x8] sm:$0xff] %v749_v28  ;;  %1073 = vpow2.f32 %v720_v27 }
 0x1ce   : > { %v680_v29 = vpop.f32.mrf.mxu2 }
 0x1cf   : > { %v681_v30 = vadd.f32 %v1358_v12, %v680_v29 }
 0x1d1   : > { %v1074_v19 = vpop.eup %1073  ;;  %v722_v31 = vmul.f32 1.442695, %v681_v30 }
 0x1d2   : > { %v750_v32 = vsel %vm715_vm1, %v1074_v19, %v679_v25 }
 0x1d3   : > { %766 = vst [vmem:[%s1370_s20 + $0x10] sm:$0xff] %v750_v32  ;;  %1075 = vpow2.f32 %v722_v31 }
 0x1d6   : > { %v683_v33 = vpop.f32.mrf.mxu2 }
 0x1d7   : > { %v684_v34 = vadd.f32 %v1358_v12, %v683_v33 }
 0x1d9   : > { %v1076_v35 = vpop.eup %1075  ;;  %v724_v36 = vmul.f32 1.442695, %v684_v34 }
 0x1da   : > { %v751_v37 = vsel %vm715_vm1, %v1076_v35, %v681_v30 }
 0x1db   : > { %767 = vst [vmem:[%s1370_s20 + $0x18] sm:$0xff] %v751_v37  ;;  %1077 = vpow2.f32 %v724_v36 }
 0x1de   : > { %v685_v38 = vpop.f32.mrf.mxu2 }
 0x1df   : > { %v686_v39 = vadd.f32 %v1358_v12, %v685_v38 }
 0x1e1   : > { %v1078_v40 = vpop.eup %1077  ;;  %v726_v41 = vmul.f32 1.442695, %v686_v39 }
 0x1e2   : > { %v752_v42 = vsel %vm715_vm1, %v1078_v40, %v684_v34 }
 0x1e3   : > { %768 = vst [vmem:[%s1370_s20 + $0x20] sm:$0xff] %v752_v42  ;;  %1079 = vpow2.f32 %v726_v41 }
 0x1e6   : > { %v688_v43 = vpop.f32.mrf.mxu2 }
 0x1e7   : > { %v689_v44 = vadd.f32 %v1358_v12, %v688_v43 }
 0x1e9   : > { %v1080_v45 = vpop.eup %1079  ;;  %v728_v46 = vmul.f32 1.442695, %v689_v44 }
 0x1ea   : > { %v753_v47 = vsel %vm715_vm1, %v1080_v45, %v686_v39 }
 0x1eb   : > { %769 = vst [vmem:[%s1370_s20 + $0x28] sm:$0xff] %v753_v47  ;;  %1081 = vpow2.f32 %v728_v46 }
 0x1ee   : > { %v690_v48 = vpop.f32.mrf.mxu2 }
 0x1ef   : > { %v691_v49 = vadd.f32 %v1358_v12, %v690_v48 }
 0x1f1   : > { %v1082_v50 = vpop.eup %1081  ;;  %v730_v51 = vmul.f32 1.442695, %v691_v49 }
 0x1f2   : > { %v754_v52 = vsel %vm715_vm1, %v1082_v50, %v689_v44 }
 0x1f3   : > { %770 = vst [vmem:[%s1370_s20 + $0x30] sm:$0xff] %v754_v52  ;;  %1083 = vpow2.f32 %v730_v51 }
 0x1f6   : > { %v693_v53 = vpop.f32.mrf.mxu2 }
 0x1f7   : > { %v694_v54 = vadd.f32 %v1358_v12, %v693_v53 }
 0x1f9   : > { %v1084_v55 = vpop.eup %1083  ;;  %v732_v56 = vmul.f32 1.442695, %v694_v54 }
 0x1fa   : > { %v755_v57 = vsel %vm715_vm1, %v1084_v55, %v691_v49 }
 0x1fb   : > { %771 = vst [vmem:[%s1370_s20 + $0x38] sm:$0xff] %v755_v57  ;;  %1085 = vpow2.f32 %v732_v56 }
 0x1fe   : > { %v695_v58 = vpop.f32.mrf.mxu2 }
 0x1ff   : > { %v696_v59 = vadd.f32 %v1358_v12, %v695_v58 }
 0x201   : > { %v1086_v60 = vpop.eup %1085  ;;  %v734_v61 = vmul.f32 1.442695, %v696_v59 }
 0x202   : > { %v756_v62 = vsel %vm715_vm1, %v1086_v60, %v694_v54 }
 0x203   : > { %772 = vst [vmem:[%s1370_s20 + $0x40] sm:$0xff] %v756_v62  ;;  %1087 = vpow2.f32 %v734_v61 }
 0x206   : > { %v698_v63 = vpop.f32.mrf.mxu2 }
 0x207   : > { %v699_v0 = vadd.f32 %v1358_v12, %v698_v63 }
 0x209   : > { %v1088_v1 = vpop.eup %1087  ;;  %v736_v2 = vmul.f32 1.442695, %v699_v0 }
 0x20a   : > { %v757_v3 = vsel %vm715_vm1, %v1088_v1, %v696_v59 }
 0x20b   : > { %773 = vst [vmem:[%s1370_s20 + $0x48] sm:$0xff] %v757_v3  ;;  %1089 = vpow2.f32 %v736_v2 }
 0x20e   : > { %v700_v4 = vpop.f32.mrf.mxu2 }
 0x20f   : > { %v701_v5 = vadd.f32 %v1358_v12, %v700_v4 }
 0x211   : > { %v1090_v6 = vpop.eup %1089  ;;  %v738_v7 = vmul.f32 1.442695, %v701_v5 }
 0x212   : > { %v758_v8 = vsel %vm715_vm1, %v1090_v6, %v699_v0 }
 0x213   : > { %774 = vst [vmem:[%s1370_s20 + $0x50] sm:$0xff] %v758_v8  ;;  %1091 = vpow2.f32 %v738_v7 }
 0x219   : > { %v1092_v9 = vpop.eup %1091 }
 0x21a   : > { %v759_v10 = vsel %vm715_vm1, %v1092_v9, %v701_v5 }
 0x21b   : > { %775 = vst [vmem:[%s1370_s20 + $0x58] sm:$0xff] %v759_v10 }
 0x21c   : > { %v703_v11 = vpop.f32.mrf.mxu3 }
 0x21d   : > { %v704_v13 = vadd.f32 %v1358_v12, %v703_v11 }
 0x21f   : > { %v740_v14 = vmul.f32 1.442695, %v704_v13 }
 0x221   : > { %1093 = vpow2.f32 %v740_v14 }
 0x224   : > { %v705_v15 = vpop.f32.mrf.mxu3 }
 0x225   : > { %v706_v16 = vadd.f32 %v1358_v12, %v705_v15 }
 0x227   : > { %v1094_v18 = vpop.eup %1093  ;;  %v742_v20 = vmul.f32 1.442695, %v706_v16 }
 0x228   : > { %v760_v21 = vsel %vm715_vm1, %v1094_v18, %v704_v13 }
 0x229   : > { %776 = vst [vmem:[%s1370_s20 + $0x60] sm:$0xff] %v760_v21  ;;  %1095 = vpow2.f32 %v742_v20 }
 0x22c   : > { %v708_v22 = vpop.f32.mrf.mxu3 }
 0x22d   : > { %v709_v23 = vadd.f32 %v1358_v12, %v708_v22 }
 0x22f   : > { %v1096_v24 = vpop.eup %1095  ;;  %v744_v25 = vmul.f32 1.442695, %v709_v23 }
 0x230   : > { %v761_v26 = vsel %vm715_vm1, %v1096_v24, %v706_v16 }
 0x231   : > { %777 = vst [vmem:[%s1370_s20 + $0x68] sm:$0xff] %v761_v26  ;;  %1097 = vpow2.f32 %v744_v25 }
 0x234   : > { %v710_v27 = vpop.f32.mrf.mxu3 }
 0x235   : > { %v711_v28 = vadd.f32 %v1358_v12, %v710_v27 }
 0x237   : > { %v1098_v29 = vpop.eup %1097  ;;  %v746_v30 = vmul.f32 1.442695, %v711_v28 }
 0x238   : > { %v762_v19 = vsel %vm715_vm1, %v1098_v29, %v709_v23 }
 0x239   : > { %778 = vst [vmem:[%s1370_s20 + $0x70] sm:$0xff] %v762_v19  ;;  %1099 = vpow2.f32 %v746_v30 }
 0x23f   : > { %v1100_v31 = vpop.eup %1099 }
 0x240   : > { %v763_v12 = vsel %vm715_vm1, %v1100_v31, %v711_v28 }
 0x241   : > { %779 = vst [vmem:[%s1370_s20 + $0x78] sm:$0xff] %v763_v12 }
 0x242   : > { %1128 = shalt.err (!%p1125_p3)
}
 0x243   : > { %s1165_s18 = smov 128   ;;  %s1166_s20 = smov 8  }
 0x244   : > { %1025 = dma.vmem_to_hbm [thread:$0]  (%p1245_p5), %s794_s9, 2048, %s796_s21, %s781_s28, %s1165_s18, %s1165_s18, %s1166_s20  }
 0x245 PF: > { %p1031_p4 = scmp.ge.s32.totalorder %s1163_s27, 2  ;;  %s810_s23 = sand.u32 1, %s1151_s24  }
 0x246   : > { %s811_s29 = scalar_lea.sflag [#allocation3], %s810_s23 }
 0x247   : > { %p1028_p7 = pnand %p1031_p4, %p1249_p6 }
 0x249   : > { %p1029_p8 = pneg %p1028_p7 }
 0x24b   : > { %1146 = dma.done.wait (%p1029_p8), %s811_s29, 2048  }
 0x24c   : > { %1148 = vsyncadd (%p1029_p8), %s811_s29, 4294965248  ;;  %p17_p9 = scmp.ge.s32.totalorder %s1232_s30, 6   ;;  %s1476_s24 = smov %s1155_s25 }
 0x24d   : > { %s1477_s25 = smov %s1159_s26  ;;  %s1478_s26 = smov %s1243_s10 }
 0x24e   : > { %s1479_s27 = smov %s1232_s30  ;;  %19 = sbr.rel (!%p17_p9) target bundleno = 3 (0x3), region = 83 }
 0x253   :  { %817 = vsyncpa [#allocation3], 1 }
 0x254   :  { %819 = vsyncpa [#allocation3 + $0x1], 1 }

</bundles_post_ra>
